<compile_context>
chip_gen: v7x
topology: tpu7x:2x2x1
jax: 0.10.0
libtpu: 0.0.40
codegen_flags: <defaults>
</compile_context>

<pallas_src>
import jax
import jax.numpy as jnp
from jax import lax
from jax.experimental import pallas as pl
from jax.experimental.pallas import tpu as pltpu


_VMEM_SPEC = pl.BlockSpec(memory_space=pltpu.MemorySpace.VMEM)


# ----------------------------------------------------------------------------
# Kernel 1: latent preconditioning  lrelu(latent * std + mean), slope 0.2
# Single block, rows = B*L on sublanes, D=512 on lanes.
# ----------------------------------------------------------------------------
def _latent_transform_kernel(std_ref, mean_ref, lat_ref, out_ref):
    x = lat_ref[...] * std_ref[...] + mean_ref[...]      # (R, D) * (1, D) broadcast
    out_ref[...] = jnp.maximum(x, 0.2 * x)                # LeakyReLU(0.2)


def latent_transform(latent, std, mean):
    """latent: (B, L, D) f32; std, mean: (1, D) f32 (broadcast over rows)."""
    B, L, D = latent.shape
    lat2d = latent.reshape(B * L, D)
    out2d = pl.pallas_call(
        _latent_transform_kernel,
        out_shape=jax.ShapeDtypeStruct((B * L, D), latent.dtype),
        in_specs=[_VMEM_SPEC, _VMEM_SPEC, _VMEM_SPEC],
        out_specs=_VMEM_SPEC,
    )(std, mean, lat2d)
    return out2d.reshape(B, L, D)


# ----------------------------------------------------------------------------
# Kernel 2a: radii for ALL params in one call (init-time only).
#   radii_i = sqrt(sum(p_i^2, axis=-1, keepdims=True) + 1e-9)
# ----------------------------------------------------------------------------
def _make_radii_kernel(n):
    def kernel(*refs):
        p_refs, o_refs = refs[:n], refs[n:]
        for p_ref, o_ref in zip(p_refs, o_refs):
            p = p_ref[...]
            o_ref[...] = jnp.sqrt(jnp.sum(p * p, axis=-1, keepdims=True) + 1e-9)
    return kernel


def compute_radii(params2d):
    """params2d: list of (R_i, N_i) f32 arrays -> tuple of (R_i, 1) radii."""
    n = len(params2d)
    out_shapes = tuple(
        jax.ShapeDtypeStruct((p.shape[0], 1), p.dtype) for p in params2d
    )
    return pl.pallas_call(
        _make_radii_kernel(n),
        out_shape=out_shapes,
        in_specs=[_VMEM_SPEC] * n,
        out_specs=tuple(_VMEM_SPEC for _ in range(n)),
    )(*params2d)


# ----------------------------------------------------------------------------
# Kernel 2b: fused spherical projection for ALL params in one call (hot path).
#   p_i <- p_i * radii_i * rsqrt(sum(p_i^2, axis=-1, keepdims=True) + 1e-9)
# In-place via input_output_aliases (param i -> output i).
# ----------------------------------------------------------------------------
def _make_project_kernel(n):
    def kernel(*refs):
        p_refs, r_refs, o_refs = refs[:n], refs[n:2 * n], refs[2 * n:]
        for p_ref, r_ref, o_ref in zip(p_refs, r_refs, o_refs):
            p = p_ref[...]
            sumsq = jnp.sum(p * p, axis=-1, keepdims=True)
            o_ref[...] = p * (r_ref[...] * lax.rsqrt(sumsq + 1e-9))
    return kernel


def spherical_project(params2d, radii):
    """params2d: list of (R_i, N_i); radii: list of (R_i, 1). Returns projected params."""
    n = len(params2d)
    out_shapes = tuple(jax.ShapeDtypeStruct(p.shape, p.dtype) for p in params2d)
    return pl.pallas_call(
        _make_project_kernel(n),
        out_shape=out_shapes,
        in_specs=[_VMEM_SPEC] * (2 * n),
        out_specs=tuple(_VMEM_SPEC for _ in range(n)),
        input_output_aliases={i: i for i in range(n)},   # in-place param update
    )(*params2d, *radii)


# ----------------------------------------------------------------------------
# Pure-JAX references (correctness checking only)
# ----------------------------------------------------------------------------
def _latent_transform_ref(latent, std, mean):
    x = latent * std[None] + mean[None]
    return jnp.where(x > 0, x, 0.2 * x)


def _radii_ref(p2d):
    return jnp.sqrt(jnp.sum(p2d * p2d, axis=-1, keepdims=True) + 1e-9)


def _project_ref(p2d, radii):
    return p2d / _radii_ref(p2d) * radii


if __name__ == "__main__":
    key = jax.random.PRNGKey(0)
    k_lat, k_std, k_mean, k_noise = jax.random.split(key, 4)

    batch_size = 2
    n_layers = 18          # StyleGAN w+ layers
    latent_dim = 512

    # latent = torch.randn((batch_size, 18, 512))
    latent = jax.random.normal(
        k_lat, (batch_size, n_layers, latent_dim), dtype=jnp.float32)
    # gaussian_fit['std'] / ['mean'] — deterministic synthetic values, (1, 512)
    gauss_std = 1.0 + 0.1 * jax.random.uniform(
        k_std, (1, latent_dim), dtype=jnp.float32)
    gauss_mean = 0.1 * jax.random.normal(
        k_mean, (1, latent_dim), dtype=jnp.float32)

    # Trainable noise layers (first 5), original shape (B, 1, res, res)
    num_trainable_noise_layers = 5
    noise_vars = []
    nk = k_noise
    for i in range(num_trainable_noise_layers):
        nk, sub = jax.random.split(nk)
        res = 2 ** (i // 2 + 2)
        nz = jax.random.normal(sub, (batch_size, 1, res, res), dtype=jnp.float32)
        noise_vars.append(nz)

    # ---- 1) latent preconditioning (hot path, every optimization step) ----
    latent_in = latent_transform(latent, gauss_std, gauss_mean)
    jax.block_until_ready(latent_in)
    ref_lat = _latent_transform_ref(latent, gauss_std, gauss_mean)
    assert jnp.allclose(latent_in, ref_lat, atol=1e-5, rtol=1e-5)

    # ---- 2) SphericalOptimizer: flatten params so dims>=2 -> last axis ----
    # latent: (B, 18, 512) -> (B*18, 512); noise: (B, 1, H, W) -> (B, H*W)
    params2d = [latent.reshape(batch_size * n_layers, latent_dim)] + [
        nz.reshape(batch_size, -1) for nz in noise_vars
    ]

    # references (computed before the aliased kernel call)
    radii_refs = [_radii_ref(p) for p in params2d]
    proj_refs = [_project_ref(p, r) for p, r in zip(params2d, radii_refs)]

    # radii at init (one fused pallas_call)
    radii = compute_radii(params2d)
    jax.block_until_ready(radii)
    for r, r_ref in zip(radii, radii_refs):
        assert jnp.allclose(r, r_ref, atol=1e-5, rtol=1e-5)

    # projection each optimizer step (one fused pallas_call for all params)
    projected = spherical_project(params2d, list(radii))
    jax.block_until_ready(projected)
    for p_out, p_ref in zip(projected, proj_refs):
        assert jnp.allclose(p_out, p_ref, atol=1e-5, rtol=1e-4)

    # TODO(synk): G_synthesis (StyleGAN generator) weights/architecture,
    # LossBuilder ('100*L2+0.05*GEOCROSS'), Adam update + LR schedule and
    # autograd are external to the provided module source and not reproduced.

    print("KERNEL_OK")
</pallas_src>

<mosaic_0001>
module attributes {stable_mosaic.version = 11 : i64} {
  func.func @_latent_transform_kernel(%arg0: memref<1x512xf32, #tpu.memory_space<vmem>>, %arg1: memref<1x512xf32, #tpu.memory_space<vmem>>, %arg2: memref<36x512xf32, #tpu.memory_space<vmem>>, %arg3: memref<36x512xf32, #tpu.memory_space<vmem>>) attributes {dimension_semantics = [], scalar_prefetch = 0 : i64, scratch_operands = 0 : i64, tpu.core_type = #tpu.core_type<tc>} {
    %c0 = arith.constant 0 : index
    %c0_0 = arith.constant 0 : index
    %0 = vector.load %arg2[%c0, %c0_0] : memref<36x512xf32, #tpu.memory_space<vmem>>, vector<36x512xf32>
    %c0_1 = arith.constant 0 : index
    %c0_2 = arith.constant 0 : index
    %1 = vector.load %arg0[%c0_1, %c0_2] : memref<1x512xf32, #tpu.memory_space<vmem>>, vector<1x512xf32>
    %2 = vector.broadcast %1 : vector<1x512xf32> to vector<36x512xf32>
    %3 = arith.mulf %0, %2 : vector<36x512xf32>
    %c0_3 = arith.constant 0 : index
    %c0_4 = arith.constant 0 : index
    %4 = vector.load %arg1[%c0_3, %c0_4] : memref<1x512xf32, #tpu.memory_space<vmem>>, vector<1x512xf32>
    %5 = vector.broadcast %4 : vector<1x512xf32> to vector<36x512xf32>
    %6 = arith.addf %3, %5 : vector<36x512xf32>
    %cst = arith.constant 2.000000e-01 : f32
    %7 = vector.broadcast %cst : f32 to vector<36x512xf32>
    %8 = arith.mulf %7, %6 : vector<36x512xf32>
    %9 = arith.maximumf %6, %8 : vector<36x512xf32>
    %c0_5 = arith.constant 0 : index
    %c0_6 = arith.constant 0 : index
    %10 = vector.load %arg3[%c0_5, %c0_6] : memref<36x512xf32, #tpu.memory_space<vmem>>, vector<36x512xf32>
    tpu.vector_store %arg3[%c0_5, %c0_6], %9 {strides = array<i32>} : memref<36x512xf32, #tpu.memory_space<vmem>>, vector<36x512xf32>,
    return
  }
}

</mosaic_0001>

<bundles_post_ra>
// kernel: tpu_custom_call.1
= control target key start
LH: loop header
LB: loop body
LE: loop exit
PB: predicated region body
PF: predicated region fallthrough
CT: control target
= control target key end

     0   :  { %8 = vsyncpa [#allocation3], 0  ;;  %s470_s0 = inlined_call_operand.hbm [shape: f32[1,512], index: 0, kind: input, shape index: {}]   ;;  %s471_s1 = inlined_call_operand.hbm [shape: f32[1,512], index: 1, kind: input, shape index: {}]   ;;  %s472_s2 = inlined_call_operand.hbm [shape: f32[36,512], index: 2, kind: input, shape index: {}]   ;;  %s473_s3 = inlined_call_operand.hbm [shape: f32[36,512], index: 3, kind: output, shape index: {}]  }
   0x1   :  { %9 = vsyncpa [#allocation6], 0 }
   0x2   :  { %10 = vsyncpa [#allocation4], 0  ;;  %s334_s12 = smov [#allocation5]   ;;  %s335_s14 = smov [#allocation2]  }
   0x3   :  { %s27_s13 = sshll.u32 %s334_s12, 4  ;;  %s17_s15 = sshll.u32 %s335_s14, 4  ;;  %s28_s13 = int_to_ptr.vmem [resolvable:$true] %s27_s13  ;;  %s18_s15 = int_to_ptr.vmem [resolvable:$true] %s17_s15 }
   0x4   :  { %s240_s18 = scalar_lea.hbm %s471_s1, 64 }
   0x5   :  { %p241_p0 = scmp.ne.s32.totalorder %s471_s1, %s240_s18  ;;  %p244_p1 = scmp.lt.u32.totalorder %s240_s18, %s471_s1 }
   0x7   :  { %p246_p2 = pnand %p244_p1, %p241_p0 }
   0x9   :  { %249 = shalt.err (!%p246_p2)
}
   0xa   :  { %s250_s23 = scalar_lea.vmem %s28_s13, 64  ;;  %p255_p4 = scmp.lt.s32.totalorder %s28_s13, %s28_s13 }
   0xb   :  { %p251_p3 = scmp.ne.s32.totalorder %s28_s13, %s250_s23  ;;  %p256_p5 = scmp.lt.s32.totalorder %s250_s23, %s250_s23 }
   0xd   :  { %p257_p6 = por %p256_p5, %p255_p4 }
   0xf   :  { %p258_p7 = pnand %p257_p6, %p251_p3 }
  0x11   :  { %261 = shalt.err (!%p258_p7)
}
  0x12   :  { %30 = dma.hbm_to_vmem [thread:$0]  %s471_s1, 64, %s28_s13, [#allocation6]  }
  0x13   :  { %s262_s28 = scalar_lea.hbm %s470_s0, 64 }
  0x14   :  { %p263_p8 = scmp.ne.s32.totalorder %s470_s0, %s262_s28  ;;  %p266_p9 = scmp.lt.u32.totalorder %s262_s28, %s470_s0 }
  0x16   :  { %p268_p10 = pnand %p266_p9, %p263_p8 }
  0x18   :  { %271 = shalt.err (!%p268_p10)
}
  0x19   :  { %s272_s6 = scalar_lea.vmem %s18_s15, 64  ;;  %p277_p12 = scmp.lt.s32.totalorder %s18_s15, %s18_s15 }
  0x1a   :  { %p273_p11 = scmp.ne.s32.totalorder %s18_s15, %s272_s6  ;;  %p278_p13 = scmp.lt.s32.totalorder %s272_s6, %s272_s6 }
  0x1c   :  { %p279_p0 = por %p278_p13, %p277_p12 }
  0x1e   :  { %p280_p1 = pnand %p279_p0, %p273_p11 }
  0x20   :  { %283 = shalt.err (!%p280_p1)
}
  0x21   :  { %20 = dma.hbm_to_vmem [thread:$0]  %s470_s0, 64, %s18_s15, [#allocation3]  }
  0x22   :  { %s336_s8 = smov [#allocation7]   ;;  %s284_s12 = scalar_lea.hbm %s472_s2, 2560 }
  0x23   :  { %s36_s9 = sshll.u32 %s336_s8, 4  ;;  %p285_p2 = scmp.ne.s32.totalorder %s472_s2, %s284_s12  ;;  %s37_s9 = int_to_ptr.vmem [resolvable:$true] %s36_s9 }
  0x24   :  { %p288_p3 = scmp.lt.u32.totalorder %s284_s12, %s472_s2 }
  0x26   :  { %p290_p4 = pnand %p288_p3, %p285_p2 }
  0x28   :  { %293 = shalt.err (!%p290_p4)
}
  0x29   :  { %s294_s18 = scalar_lea.vmem %s37_s9, 2560  ;;  %p299_p6 = scmp.lt.s32.totalorder %s37_s9, %s37_s9 }
  0x2a   :  { %p295_p5 = scmp.ne.s32.totalorder %s37_s9, %s294_s18  ;;  %p300_p7 = scmp.lt.s32.totalorder %s294_s18, %s294_s18 }
  0x2c   :  { %p301_p8 = por %p300_p7, %p299_p6 }
  0x2e   :  { %p302_p9 = pnand %p301_p8, %p295_p5 }
  0x30   :  { %305 = shalt.err (!%p302_p9)
}
  0x31   :  { %s337_s0 = smov 512   ;;  %s338_s15 = smov 32  }
  0x32   :  { %42 = dma.hbm_to_vmem [thread:$0]  %s472_s2, 2560, %s37_s9, [#allocation6], %s337_s0, %s337_s0, %s338_s15  }
  0x33   :  { %328 = dma.done.wait [#allocation3], 64  }
  0x34   :  { %329 = vsyncadd [#allocation3], 4294967232 }
  0x35   :  { %330 = dma.done.wait [#allocation6], 2624  }
  0x36   :  { %331 = vsyncadd [#allocation6], 4294964672  ;;  %v74_v0 = vlaneseq  ;;  %v52_v6 = vld [vmem:[#allocation7] sm:$0xff]  ;;  %v72_v7 = vld [vmem:[#allocation2] sm:$0xf]  ;;  %s339_s2 = smov [#allocation8]  }
  0x37   :  { %v114_v8 = vld [vmem:[#allocation5] sm:$0xf]  ;;  %v53_v11 = vld [vmem:[#allocation7 + $0x8] sm:$0xff]  ;;  %v54_v14 = vld [vmem:[#allocation7 + $0x10] sm:$0xff]  ;;  %s221_s21 = sshll.u32 %s339_s2, 4  ;;  %s222_s21 = int_to_ptr.vmem [resolvable:$true] %s221_s21 }
  0x38   :  { %v75_v1 = vshrl.u32 %v74_v0, 7  ;;  %v55_v15 = vld [vmem:[#allocation7 + $0x18] sm:$0xff]  ;;  %v56_v20 = vld [vmem:[#allocation7 + $0x20] sm:$0xff]  ;;  %v57_v21 = vld [vmem:[#allocation7 + $0x28] sm:$0xff]  ;;  %s306_s22 = scalar_lea.vmem %s222_s21, 2560  ;;  %p311_p11 = scmp.lt.s32.totalorder %s222_s21, %s222_s21 }
  0x39   :  { %v58_v22 = vld [vmem:[#allocation7 + $0x30] sm:$0xff]  ;;  %v59_v27 = vld [vmem:[#allocation7 + $0x38] sm:$0xff]  ;;  %v60_v32 = vld [vmem:[#allocation7 + $0x40] sm:$0xff]  ;;  %p307_p10 = scmp.ne.s32.totalorder %s222_s21, %s306_s22  ;;  %p312_p12 = scmp.lt.s32.totalorder %s306_s22, %s306_s22 }
  0x3a   :  { %v76_v2 = vsub.s32 0, %v75_v1  ;;  %v80_v3 = vsub.s32 1, %v75_v1  ;;  %v84_v4 = vsub.s32 2, %v75_v1  ;;  %v88_v5 = vsub.s32 3, %v75_v1  ;;  %v61_v37 = vld [vmem:[#allocation7 + $0x48] sm:$0xff]  ;;  %v62_v42 = vld [vmem:[#allocation7 + $0x50] sm:$0xff] }
  0x3b   :  { %v63_v55 = vld [vmem:[#allocation7 + $0x58] sm:$0xff]  ;;  %v64_v56 = vld [vmem:[#allocation7 + $0x60] sm:$0xff]  ;;  %v65_v57 = vld [vmem:[#allocation7 + $0x68] sm:$0xff]  ;;  %p313_p13 = por %p312_p12, %p311_p11 }
  0x3c   :  { %v399_v9 = vrot.slane %v72_v7, %v76_v2  ;;  %v401_v10 = vrot.slane %v114_v8, %v76_v2  ;;  %v403_v12 = vrot.slane %v72_v7, %v80_v3  ;;  %v405_v13 = vrot.slane %v114_v8, %v80_v3  ;;  %v66_v62 = vld [vmem:[#allocation7 + $0x70] sm:$0xff]  ;;  %v67_v3 = vld [vmem:[#allocation7 + $0x78] sm:$0xff] }
  0x3d   :  { %v407_v16 = vrot.slane %v72_v7, %v84_v4  ;;  %v409_v17 = vrot.slane %v114_v8, %v84_v4  ;;  %v411_v18 = vrot.slane %v72_v7, %v88_v5  ;;  %v413_v19 = vrot.slane %v114_v8, %v88_v5  ;;  %p314_p0 = pnand %p313_p13, %p307_p10 }
  0x3e   :  { %v94_v23 = vmul.f32 %v399_v9, %v52_v6  ;;  %v95_v24 = vmul.f32 %v403_v12, %v53_v11  ;;  %v98_v25 = vmul.f32 %v399_v9, %v56_v20  ;;  %v99_v26 = vmul.f32 %v403_v12, %v57_v21 }
  0x3f   :  { %v96_v28 = vmul.f32 %v407_v16, %v54_v14  ;;  %v97_v29 = vmul.f32 %v411_v18, %v55_v15  ;;  %v100_v30 = vmul.f32 %v407_v16, %v58_v22  ;;  %v101_v31 = vmul.f32 %v411_v18, %v59_v27 }
  0x40   :  { %v136_v33 = vadd.f32 %v401_v10, %v94_v23  ;;  %v137_v34 = vadd.f32 %v405_v13, %v95_v24  ;;  %v140_v35 = vadd.f32 %v401_v10, %v98_v25  ;;  %v141_v36 = vadd.f32 %v405_v13, %v99_v26  ;;  %v68_v24 = vld [vmem:[#allocation7 + $0x80] sm:$0xf]  ;;  %v69_v25 = vld [vmem:[#allocation7 + $0x88] sm:$0xf] }
  0x41   :  { %v138_v38 = vadd.f32 %v409_v17, %v96_v28  ;;  %v139_v39 = vadd.f32 %v413_v19, %v97_v29  ;;  %v142_v40 = vadd.f32 %v409_v17, %v100_v30  ;;  %v143_v41 = vadd.f32 %v413_v19, %v101_v31  ;;  %v70_v30 = vld [vmem:[#allocation7 + $0x90] sm:$0xf] }
  0x42   :  { %v156_v43 = vmul.f32 0.2, %v136_v33  ;;  %v157_v44 = vmul.f32 0.2, %v137_v34  ;;  %v160_v45 = vmul.f32 0.2, %v140_v35  ;;  %v102_v46 = vmul.f32 %v399_v9, %v60_v32 }
  0x43   :  { %v158_v47 = vmul.f32 0.2, %v138_v38  ;;  %v159_v48 = vmul.f32 0.2, %v139_v39  ;;  %v161_v49 = vmul.f32 0.2, %v141_v36  ;;  %v103_v50 = vmul.f32 %v403_v12, %v61_v37 }
  0x44   :  { %v176_v51 = vmax.f32 %v136_v33, %v156_v43  ;;  %v177_v52 = vmax.f32 %v137_v34, %v157_v44  ;;  %v180_v53 = vmax.f32 %v140_v35, %v160_v45  ;;  %v162_v54 = vmul.f32 0.2, %v142_v40 }
  0x45   :  { %v178_v58 = vmax.f32 %v138_v38, %v158_v47  ;;  %v179_v59 = vmax.f32 %v139_v39, %v159_v48  ;;  %v181_v60 = vmax.f32 %v141_v36, %v161_v49  ;;  %v163_v61 = vmul.f32 0.2, %v143_v41  ;;  %v71_v39 = vld [vmem:[#allocation7 + $0x98] sm:$0xf] }
  0x46   :  { %196 = vst [vmem:[#allocation8] sm:$0xff] %v176_v51  ;;  %197 = vst [vmem:[#allocation8 + $0x8] sm:$0xff] %v177_v52  ;;  %v182_v63 = vmax.f32 %v142_v40, %v162_v54  ;;  %v144_v0 = vadd.f32 %v401_v10, %v102_v46  ;;  %v145_v1 = vadd.f32 %v405_v13, %v103_v50 }
  0x47   :  { %200 = vst [vmem:[#allocation8 + $0x20] sm:$0xff] %v180_v53  ;;  %v104_v2 = vmul.f32 %v407_v16, %v62_v42  ;;  %198 = vst [vmem:[#allocation8 + $0x10] sm:$0xff] %v178_v58  ;;  %v183_v4 = vmax.f32 %v143_v41, %v163_v61  ;;  %v105_v5 = vmul.f32 %v411_v18, %v63_v55 }
  0x48   :  { %199 = vst [vmem:[#allocation8 + $0x18] sm:$0xff] %v179_v59  ;;  %201 = vst [vmem:[#allocation8 + $0x28] sm:$0xff] %v181_v60  ;;  %v106_v6 = vmul.f32 %v399_v9, %v64_v56  ;;  %v107_v7 = vmul.f32 %v403_v12, %v65_v57  ;;  %v164_v8 = vmul.f32 0.2, %v144_v0  ;;  %v165_v11 = vmul.f32 0.2, %v145_v1 }
  0x49   :  { %202 = vst [vmem:[#allocation8 + $0x30] sm:$0xff] %v182_v63  ;;  %v146_v14 = vadd.f32 %v409_v17, %v104_v2  ;;  %v108_v15 = vmul.f32 %v407_v16, %v66_v62  ;;  %203 = vst [vmem:[#allocation8 + $0x38] sm:$0xff] %v183_v4  ;;  %v147_v20 = vadd.f32 %v413_v19, %v105_v5 }
  0x4a   :  { %v148_v21 = vadd.f32 %v401_v10, %v106_v6  ;;  %v149_v22 = vadd.f32 %v405_v13, %v107_v7  ;;  %v109_v23 = vmul.f32 %v411_v18, %v67_v3  ;;  %v184_v26 = vmax.f32 %v144_v0, %v164_v8 }
  0x4b   :  { %v185_v27 = vmax.f32 %v145_v1, %v165_v11  ;;  %v166_v28 = vmul.f32 0.2, %v146_v14  ;;  %v150_v29 = vadd.f32 %v409_v17, %v108_v15  ;;  %v167_v31 = vmul.f32 0.2, %v147_v20 }
  0x4c   :  { %v168_v32 = vmul.f32 0.2, %v148_v21  ;;  %v169_v33 = vmul.f32 0.2, %v149_v22  ;;  %v151_v34 = vadd.f32 %v413_v19, %v109_v23  ;;  %204 = vst [vmem:[#allocation8 + $0x40] sm:$0xff] %v184_v26  ;;  %v110_v37 = vmul.f32 %v399_v9, %v68_v24 }
  0x4d   :  { %205 = vst [vmem:[#allocation8 + $0x48] sm:$0xff] %v185_v27  ;;  %v186_v35 = vmax.f32 %v146_v14, %v166_v28  ;;  %v170_v36 = vmul.f32 0.2, %v150_v29  ;;  %v111_v38 = vmul.f32 %v403_v12, %v69_v25  ;;  %v187_v40 = vmax.f32 %v147_v20, %v167_v31 }
  0x4e   :  { %v188_v41 = vmax.f32 %v148_v21, %v168_v32  ;;  %v189_v42 = vmax.f32 %v149_v22, %v169_v33  ;;  %v171_v43 = vmul.f32 0.2, %v151_v34  ;;  %v152_v45 = vadd.f32 %v401_v10, %v110_v37 }
  0x4f   :  { %206 = vst [vmem:[#allocation8 + $0x50] sm:$0xff] %v186_v35  ;;  %v190_v44 = vmax.f32 %v150_v29, %v170_v36  ;;  %v153_v46 = vadd.f32 %v405_v13, %v111_v38  ;;  %v112_v47 = vmul.f32 %v407_v16, %v70_v30  ;;  %207 = vst [vmem:[#allocation8 + $0x58] sm:$0xff] %v187_v40 }
  0x50   :  { %208 = vst [vmem:[#allocation8 + $0x60] sm:$0xff] %v188_v41  ;;  %209 = vst [vmem:[#allocation8 + $0x68] sm:$0xff] %v189_v42  ;;  %v191_v48 = vmax.f32 %v151_v34, %v171_v43  ;;  %v113_v9 = vmul.f32 %v411_v18, %v71_v39  ;;  %v172_v12 = vmul.f32 0.2, %v152_v45 }
  0x51   :  { %210 = vst [vmem:[#allocation8 + $0x70] sm:$0xff] %v190_v44  ;;  %v173_v49 = vmul.f32 0.2, %v153_v46  ;;  %v154_v50 = vadd.f32 %v409_v17, %v112_v47 }
  0x52   :  { %211 = vst [vmem:[#allocation8 + $0x78] sm:$0xff] %v191_v48  ;;  %v155_v51 = vadd.f32 %v413_v19, %v113_v9  ;;  %v192_v52 = vmax.f32 %v152_v45, %v172_v12 }
  0x53   :  { %v193_v10 = vmax.f32 %v153_v46, %v173_v49  ;;  %v174_v53 = vmul.f32 0.2, %v154_v50 }
  0x54   :  { %v175_v13 = vmul.f32 0.2, %v155_v51  ;;  %212 = vst [vmem:[#allocation8 + $0x80] sm:$0xf] %v192_v52 }
  0x55   :  { %213 = vst [vmem:[#allocation8 + $0x88] sm:$0xf] %v193_v10  ;;  %v194_v16 = vmax.f32 %v154_v50, %v174_v53 }
  0x56   :  { %v195_v54 = vmax.f32 %v155_v51, %v175_v13 }
  0x57   :  { %214 = vst [vmem:[#allocation8 + $0x90] sm:$0xf] %v194_v16 }
  0x58   :  { %215 = vst [vmem:[#allocation8 + $0x98] sm:$0xf] %v195_v54 }
  0x59   :  { %317 = shalt.err (!%p314_p0)
}
  0x5a   :  { %s318_s25 = scalar_lea.hbm %s473_s3, 2560 }
  0x5b   :  { %p319_p1 = scmp.ne.s32.totalorder %s473_s3, %s318_s25  ;;  %p322_p2 = scmp.lt.u32.totalorder %s318_s25, %s473_s3 }
  0x5d   :  { %p324_p3 = pnand %p322_p2, %p319_p1 }
  0x5f   :  { %327 = shalt.err (!%p324_p3)
}
  0x60   :  { %227 = dma.vmem_to_hbm [thread:$0]  %s222_s21, 2560, %s473_s3, [#allocation4], %s337_s0, %s337_s0, %s338_s15  }
  0x61   :  { %332 = dma.done.wait [#allocation4], 2560  }
  0x62   :  { %333 = vsyncadd [#allocation4], 4294964736 }
  0x63   :  { %231 = vsyncpa [#allocation3], 1 }
  0x64   :  { %232 = vsyncpa [#allocation6], 1 }
  0x65   :  { %233 = vsyncpa [#allocation4], 1 }

</bundles_post_ra>
